<compile_context>
chip_gen: v6e
topology: v6e:2x2x1
jax: 0.10.0
libtpu: 0.0.40
codegen_flags: <defaults>
</compile_context>

<pallas_src>
import jax
import jax.numpy as jnp
from jax import lax
from jax.experimental import pallas as pl
from jax.experimental.pallas import tpu as pltpu


_SMALL_K = 8  # layer-1 VPU broadcast path when state_dim <= this


def _mish(x):
    # mish(x) = x * tanh(softplus(x)); with t = exp(x):
    #   tanh(log1p(t)) = t*(t+2) / (t*(t+2) + 2)
    # One EUP exp + one EUP approx reciprocal per element; for x > 20,
    # mish(x) ~= x (guard computed once, exp input zeroed on that branch).
    big = x > 20.0
    t = jnp.exp(jnp.where(big, 0.0, x))
    u = t * (t + 2.0)
    return jnp.where(big, x, x * u * pl.reciprocal(u + 2.0, approx=True))


def _make_kernel(n_sub, sub_rows, state_dim):
    """Kernel over one (tile_m, *) row tile, sub-blocked into n_sub chunks."""

    def kernel(x_ref, w1_ref, w2_ref, w3_ref, b_ref, o_ref):
        b1 = b_ref[0:1, :]
        b2 = b_ref[1:2, :]
        b3 = b_ref[2:3, :]

        def chunk(c, carry):
            r0 = pl.multiple_of(c * sub_rows, 8)
            x = x_ref[pl.ds(r0, sub_rows), :].astype(jnp.float32)

            # ---- layer 1: Linear(state_dim -> hidden) + Mish ---------------
            if state_dim <= _SMALL_K:
                # tiny K: VPU broadcast MACs; bias fused into the first term
                h = x[:, 0:1] * w1_ref[0:1, :] + b1
                for k in range(1, state_dim):
                    h = h + x[:, k:k + 1] * w1_ref[k:k + 1, :]
            else:
                h = jnp.dot(x.astype(w1_ref.dtype), w1_ref[...],
                            preferred_element_type=jnp.float32) + b1
            h = _mish(h)

            # ---- layer 2: Linear(hidden -> hidden) + Mish (bf16 MXU) -------
            h = jnp.dot(h.astype(w2_ref.dtype), w2_ref[...],
                        preferred_element_type=jnp.float32)
            h = _mish(h + b2)

            # ---- layer 3: Linear(hidden -> hidden), no activation ----------
            h = jnp.dot(h.astype(w3_ref.dtype), w3_ref[...],
                        preferred_element_type=jnp.float32)
            o_ref[pl.ds(r0, sub_rows), :] = (h + b3).astype(o_ref.dtype)
            return carry

        # Unrolled so the LLO scheduler can interleave chunk i's Mish with
        # chunk i+1's MXU pushes (chunks are independent row ranges).
        lax.fori_loop(0, n_sub, chunk, 0, unroll=True)

    return kernel


def _round_up(n, m):
    return ((n + m - 1) // m) * m


def pcxy_position_encoder(state, params, *, tile_m=1024, use_bf16=True,
                          out_dtype=jnp.float32, max_sub_blocks=4):
    """state: (..., state_dim) -> (..., hidden_dim), matching the PyTorch module."""
    (w1, b1), (w2, b2), (w3, b3) = params
    state_dim, hidden_dim = w1.shape
    assert state.shape[-1] == state_dim

    orig_shape = state.shape
    x = state.reshape(-1, state_dim).astype(jnp.float32)
    m = x.shape[0]

    # Row tile: large tiles amortize the ~0.35us per-grid-step overhead, but
    # cap so the grid has >= 2 steps whenever possible (v7x 2-TC sharding via
    # the "parallel" grid axis). Keep the tile sublane-aligned (multiple of 8).
    tile = max(8, min(int(tile_m), _round_up(pl.cdiv(m, 2), 8)))
    tile = _round_up(tile, 8)
    grid = (pl.cdiv(m, tile),)

    # In-kernel sub-blocking factor: largest n <= max_sub_blocks with
    # tile % (8*n) == 0, so every chunk stays sublane-aligned.
    n_sub = 1
    for cand in range(min(max_sub_blocks, tile // 8), 0, -1):
        if tile % (cand * 8) == 0:
            n_sub = cand
            break
    sub_rows = tile // n_sub

    # MXU operands in bf16 by default (f32 accumulation); all elementwise math
    # (Mish, bias adds) stays f32. Layer 1 stays f32 on the VPU for tiny K.
    mxu_dtype = jnp.bfloat16 if use_bf16 else jnp.float32
    w1 = w1.astype(jnp.float32 if state_dim <= _SMALL_K else mxu_dtype)
    w2 = w2.astype(mxu_dtype)
    w3 = w3.astype(mxu_dtype)
    b_all = jnp.stack([b1, b2, b3], axis=0).astype(jnp.float32)  # one resident op

    # Explicit VMEM budget: streamed x/out tiles double-buffered, resident
    # operands single-buffered, plus live f32 intermediates per sub-chunk.
    out_itemsize = jnp.dtype(out_dtype).itemsize
    est = (2 * tile * 128 * 4                               # x tiles (lane-padded)
           + 2 * tile * hidden_dim * out_itemsize           # out tiles
           + w1.size * w1.dtype.itemsize                    # W1
           + (w2.size + w3.size) * jnp.dtype(mxu_dtype).itemsize
           + 3 * hidden_dim * 4                             # biases
           + 8 * sub_rows * hidden_dim * 4)                 # live intermediates
    vmem_limit = int(min(64 * 1024 * 1024, max(32 * 1024 * 1024, 2 * est)))

    # Resident operands never change block index -> single buffer.
    def resident(shape):
        return pl.BlockSpec(shape, lambda i: (0, 0),
                            pipeline_mode=pl.Buffered(1))

    out = pl.pallas_call(
        _make_kernel(n_sub, sub_rows, state_dim),
        out_shape=jax.ShapeDtypeStruct((m, hidden_dim), out_dtype),
        grid_spec=pltpu.PrefetchScalarGridSpec(
            num_scalar_prefetch=0,
            grid=grid,
            in_specs=[
                pl.BlockSpec((tile, state_dim), lambda i: (i, 0)),  # x row tile
                resident((state_dim, hidden_dim)),                  # W1
                resident((hidden_dim, hidden_dim)),                 # W2
                resident((hidden_dim, hidden_dim)),                 # W3
                resident((3, hidden_dim)),                          # biases
            ],
            out_specs=pl.BlockSpec((tile, hidden_dim), lambda i: (i, 0)),
        ),
        compiler_params=pltpu.CompilerParams(
            dimension_semantics=("parallel",),
            vmem_limit_bytes=vmem_limit),
    )(x, w1, w2, w3, b_all)

    return out.reshape(orig_shape[:-1] + (hidden_dim,))


def init_params(key, state_dim, hidden_dim):
    """Deterministic init mimicking nn.Linear default (uniform +-1/sqrt(fan_in)).
    Weights stored as (in_features, out_features) so y = x @ W + b."""
    dims = [(state_dim, hidden_dim),
            (hidden_dim, hidden_dim),
            (hidden_dim, hidden_dim)]
    params = []
    for (fan_in, fan_out) in dims:
        key, kw, kb = jax.random.split(key, 3)
        bound = 1.0 / jnp.sqrt(jnp.float32(fan_in))
        w = jax.random.uniform(kw, (fan_in, fan_out), jnp.float32, -bound, bound)
        b = jax.random.uniform(kb, (fan_out,), jnp.float32, -bound, bound)
        params.append((w, b))
    return params


def _reference(state, params, mxu_dtype=jnp.float32):
    """Pure-JAX reference. mxu_dtype=bf16 mirrors the kernel's MXU precision
    (bf16 operands, f32 accumulation) for a precision-matched comparison."""
    (w1, b1), (w2, b2), (w3, b3) = params
    h = state.astype(jnp.float32) @ w1 + b1
    h = h * jnp.tanh(jax.nn.softplus(h))
    h = jnp.dot(h.astype(mxu_dtype), w2.astype(mxu_dtype),
                preferred_element_type=jnp.float32) + b2
    h = h * jnp.tanh(jax.nn.softplus(h))
    h = jnp.dot(h.astype(mxu_dtype), w3.astype(mxu_dtype),
                preferred_element_type=jnp.float32) + b3
    return h


if __name__ == "__main__":
    state_dim = 2      # module default
    hidden_dim = 256   # module default
    batch, seq = 2, 8

    key = jax.random.PRNGKey(0)
    key, k_in = jax.random.split(key)
    params = init_params(key, state_dim, hidden_dim)

    # state shaped like a typical (B, N_points, 2) xy-position input
    state = jax.random.normal(k_in, (batch, seq, state_dim), jnp.float32)

    out = pcxy_position_encoder(state, params)          # bf16 MXU default path
    out = jax.block_until_ready(out)

    ref_f32 = _reference(state, params)                              # pure f32
    ref_mxu = _reference(state, params, mxu_dtype=jnp.bfloat16)      # matched

    assert out.shape == (batch, seq, hidden_dim)
    assert jnp.allclose(out, ref_mxu, atol=5e-3, rtol=5e-3), \
        float(jnp.max(jnp.abs(out - ref_mxu)))
    assert jnp.allclose(out, ref_f32, atol=5e-2, rtol=5e-2), \
        float(jnp.max(jnp.abs(out - ref_f32)))

    print("KERNEL_OK")
</pallas_src>

<mosaic_0001>
module attributes {stable_mosaic.version = 11 : i64} {
  func.func @kernel(%arg0: i32, %arg1: memref<8x2xf32, #tpu.memory_space<vmem>>, %arg2: memref<2x256xf32, #tpu.memory_space<vmem>>, %arg3: memref<256x256xbf16, #tpu.memory_space<vmem>>, %arg4: memref<256x256xbf16, #tpu.memory_space<vmem>>, %arg5: memref<3x256xf32, #tpu.memory_space<vmem>>, %arg6: memref<8x256xf32, #tpu.memory_space<vmem>>) attributes {dimension_semantics = [#tpu.dimension_semantics<parallel>], iteration_bounds = array<i64: 2>, scalar_prefetch = 0 : i64, scratch_operands = 0 : i64, tpu.core_type = #tpu.core_type<tc>, window_params = [{transform_indices = @transform_0, window_bounds = array<i64: 8, 2>}, {pipeline_mode = #tpu.pipeline_mode<synchronous>, transform_indices = @transform_1, window_bounds = array<i64: 2, 256>}, {pipeline_mode = #tpu.pipeline_mode<synchronous>, transform_indices = @transform_2, window_bounds = array<i64: 256, 256>}, {pipeline_mode = #tpu.pipeline_mode<synchronous>, transform_indices = @transform_3, window_bounds = array<i64: 256, 256>}, {pipeline_mode = #tpu.pipeline_mode<synchronous>, transform_indices = @transform_4, window_bounds = array<i64: 3, 256>}, {transform_indices = @transform_5, window_bounds = array<i64: 8, 256>}]} {
    %c0 = arith.constant 0 : index
    %c0_0 = arith.constant 0 : index
    %0 = vector.load %arg5[%c0, %c0_0] : memref<3x256xf32, #tpu.memory_space<vmem>>, vector<1x256xf32>
    %c1 = arith.constant 1 : index
    %c0_1 = arith.constant 0 : index
    %1 = vector.load %arg5[%c1, %c0_1] : memref<3x256xf32, #tpu.memory_space<vmem>>, vector<1x256xf32>
    %c2 = arith.constant 2 : index
    %c0_2 = arith.constant 0 : index
    %2 = vector.load %arg5[%c2, %c0_2] : memref<3x256xf32, #tpu.memory_space<vmem>>, vector<1x256xf32>
    %c0_i32 = arith.constant 0 : i32
    %c8_i32 = arith.constant 8 : i32
    %3 = arith.muli %c0_i32, %c8_i32 : i32
    %4 = tpu.assume_multiple %3, 8 : i32
    %5 = arith.index_cast %4 : i32 to index
    %c0_3 = arith.constant 0 : index
    %6 = vector.load %arg1[%5, %c0_3] : memref<8x2xf32, #tpu.memory_space<vmem>>, vector<8x2xf32>
    %7 = vector.extract_strided_slice %6 {offsets = [0, 0], sizes = [8, 1], strides = [1, 1]} : vector<8x2xf32> to vector<8x1xf32>
    %c0_4 = arith.constant 0 : index
    %c0_5 = arith.constant 0 : index
    %8 = vector.load %arg2[%c0_4, %c0_5] : memref<2x256xf32, #tpu.memory_space<vmem>>, vector<1x256xf32>
    %9 = vector.broadcast %7 : vector<8x1xf32> to vector<8x256xf32>
    %10 = vector.broadcast %8 : vector<1x256xf32> to vector<8x256xf32>
    %11 = arith.mulf %9, %10 : vector<8x256xf32>
    %12 = vector.broadcast %0 : vector<1x256xf32> to vector<8x256xf32>
    %13 = arith.addf %11, %12 : vector<8x256xf32>
    %14 = vector.extract_strided_slice %6 {offsets = [0, 1], sizes = [8, 1], strides = [1, 1]} : vector<8x2xf32> to vector<8x1xf32>
    %c1_6 = arith.constant 1 : index
    %c0_7 = arith.constant 0 : index
    %15 = vector.load %arg2[%c1_6, %c0_7] : memref<2x256xf32, #tpu.memory_space<vmem>>, vector<1x256xf32>
    %16 = vector.broadcast %14 : vector<8x1xf32> to vector<8x256xf32>
    %17 = vector.broadcast %15 : vector<1x256xf32> to vector<8x256xf32>
    %18 = arith.mulf %16, %17 : vector<8x256xf32>
    %19 = arith.addf %13, %18 : vector<8x256xf32>
    %cst = arith.constant 2.000000e+01 : f32
    %20 = vector.broadcast %cst : f32 to vector<8x256xf32>
    %21 = arith.cmpf ogt, %19, %20 : vector<8x256xf32>
    %cst_8 = arith.constant 0.000000e+00 : f32
    %22 = vector.broadcast %cst_8 : f32 to vector<8x256xf32>
    %23 = arith.select %21, %22, %19 : vector<8x256xi1>, vector<8x256xf32>
    %24 = math.exp %23 : vector<8x256xf32>
    %cst_9 = arith.constant 2.000000e+00 : f32
    %25 = vector.broadcast %cst_9 : f32 to vector<8x256xf32>
    %26 = arith.addf %24, %25 : vector<8x256xf32>
    %27 = arith.mulf %24, %26 : vector<8x256xf32>
    %28 = arith.mulf %19, %27 : vector<8x256xf32>
    %cst_10 = arith.constant 2.000000e+00 : f32
    %29 = vector.broadcast %cst_10 : f32 to vector<8x256xf32>
    %30 = arith.addf %27, %29 : vector<8x256xf32>
    %31 = tpu.reciprocal %30 {approx = true} : vector<8x256xf32> -> vector<8x256xf32>
    %32 = arith.mulf %28, %31 : vector<8x256xf32>
    %33 = arith.select %21, %19, %32 : vector<8x256xi1>, vector<8x256xf32>
    %34 = arith.truncf %33 : vector<8x256xf32> to vector<8x256xbf16>
    %c0_11 = arith.constant 0 : index
    %c0_12 = arith.constant 0 : index
    %35 = vector.load %arg3[%c0_11, %c0_12] : memref<256x256xbf16, #tpu.memory_space<vmem>>, vector<256x256xbf16>
    %cst_13 = arith.constant dense<0.000000e+00> : vector<8x256xf32>
    %36 = tpu.matmul %34, %35, %cst_13 {dimension_numbers = #tpu.dot_dimension_numbers<[1], [0], [0], [1], [0, 0, 1, 1], [], []>} : vector<8x256xbf16>, vector<256x256xbf16>, vector<8x256xf32> -> vector<8x256xf32>
    %37 = vector.broadcast %1 : vector<1x256xf32> to vector<8x256xf32>
    %38 = arith.addf %36, %37 : vector<8x256xf32>
    %cst_14 = arith.constant 2.000000e+01 : f32
    %39 = vector.broadcast %cst_14 : f32 to vector<8x256xf32>
    %40 = arith.cmpf ogt, %38, %39 : vector<8x256xf32>
    %cst_15 = arith.constant 0.000000e+00 : f32
    %41 = vector.broadcast %cst_15 : f32 to vector<8x256xf32>
    %42 = arith.select %40, %41, %38 : vector<8x256xi1>, vector<8x256xf32>
    %43 = math.exp %42 : vector<8x256xf32>
    %cst_16 = arith.constant 2.000000e+00 : f32
    %44 = vector.broadcast %cst_16 : f32 to vector<8x256xf32>
    %45 = arith.addf %43, %44 : vector<8x256xf32>
    %46 = arith.mulf %43, %45 : vector<8x256xf32>
    %47 = arith.mulf %38, %46 : vector<8x256xf32>
    %cst_17 = arith.constant 2.000000e+00 : f32
    %48 = vector.broadcast %cst_17 : f32 to vector<8x256xf32>
    %49 = arith.addf %46, %48 : vector<8x256xf32>
    %50 = tpu.reciprocal %49 {approx = true} : vector<8x256xf32> -> vector<8x256xf32>
    %51 = arith.mulf %47, %50 : vector<8x256xf32>
    %52 = arith.select %40, %38, %51 : vector<8x256xi1>, vector<8x256xf32>
    %53 = arith.truncf %52 : vector<8x256xf32> to vector<8x256xbf16>
    %c0_18 = arith.constant 0 : index
    %c0_19 = arith.constant 0 : index
    %54 = vector.load %arg4[%c0_18, %c0_19] : memref<256x256xbf16, #tpu.memory_space<vmem>>, vector<256x256xbf16>
    %cst_20 = arith.constant dense<0.000000e+00> : vector<8x256xf32>
    %55 = tpu.matmul %53, %54, %cst_20 {dimension_numbers = #tpu.dot_dimension_numbers<[1], [0], [0], [1], [0, 0, 1, 1], [], []>} : vector<8x256xbf16>, vector<256x256xbf16>, vector<8x256xf32> -> vector<8x256xf32>
    %56 = vector.broadcast %2 : vector<1x256xf32> to vector<8x256xf32>
    %57 = arith.addf %55, %56 : vector<8x256xf32>
    %58 = arith.index_cast %4 : i32 to index
    %c0_21 = arith.constant 0 : index
    %59 = vector.load %arg6[%58, %c0_21] : memref<8x256xf32, #tpu.memory_space<vmem>>, vector<8x256xf32>
    tpu.vector_store %arg6[%58, %c0_21], %57 {strides = array<i32>} : memref<8x256xf32, #tpu.memory_space<vmem>>, vector<8x256xf32>,
    %c1_i32 = arith.constant 1 : i32
    return
  }
  func.func @transform_0(%arg0: i32) -> (i32, i32) {
    %c0_i32 = arith.constant 0 : i32
    %c0_i32_0 = arith.constant 0 : i32
    return %arg0, %c0_i32 : i32, i32
  }
  func.func @transform_1(%arg0: i32) -> (i32, i32) {
    %c0_i32 = arith.constant 0 : i32
    %c0_i32_0 = arith.constant 0 : i32
    %c0_i32_1 = arith.constant 0 : i32
    return %c0_i32, %c0_i32_0 : i32, i32
  }
  func.func @transform_2(%arg0: i32) -> (i32, i32) {
    %c0_i32 = arith.constant 0 : i32
    %c0_i32_0 = arith.constant 0 : i32
    %c0_i32_1 = arith.constant 0 : i32
    return %c0_i32, %c0_i32_0 : i32, i32
  }
  func.func @transform_3(%arg0: i32) -> (i32, i32) {
    %c0_i32 = arith.constant 0 : i32
    %c0_i32_0 = arith.constant 0 : i32
    %c0_i32_1 = arith.constant 0 : i32
    return %c0_i32, %c0_i32_0 : i32, i32
  }
  func.func @transform_4(%arg0: i32) -> (i32, i32) {
    %c0_i32 = arith.constant 0 : i32
    %c0_i32_0 = arith.constant 0 : i32
    %c0_i32_1 = arith.constant 0 : i32
    return %c0_i32, %c0_i32_0 : i32, i32
  }
  func.func @transform_5(%arg0: i32) -> (i32, i32) {
    %c0_i32 = arith.constant 0 : i32
    %c0_i32_0 = arith.constant 0 : i32
    return %arg0, %c0_i32 : i32, i32
  }
}

</mosaic_0001>

<bundles_post_ra>
// kernel: tpu_custom_call.1
= control target key start
LH: loop header
LB: loop body
LE: loop exit
PB: predicated region body
PF: predicated region fallthrough
CT: control target
= control target key end

     0   :  { %10 = vsyncpa [#allocation3], 0  ;;  %s1543_s0 = inlined_call_operand.vmem [shape: f32[16,2], index: 0, kind: input, shape index: {}]   ;;  %s1544_s1 = inlined_call_operand.vmem [shape: f32[2,256], index: 1, kind: input, shape index: {}]   ;;  %s1545_s2 = inlined_call_operand.hbm [shape: bf16[256,256], index: 2, kind: input, shape index: {}]   ;;  %s1546_s3 = inlined_call_operand.hbm [shape: bf16[256,256], index: 3, kind: input, shape index: {}]   ;;  %s1547_s4 = inlined_call_operand.vmem [shape: f32[3,256], index: 4, kind: input, shape index: {}]   ;;  %s1548_s5 = inlined_call_operand.hbm [shape: f32[16,256], index: 5, kind: output, shape index: {}]  }
   0x1   :  { %11 = vsyncpa [#allocation6], 0 }
   0x2   :  { %12 = vsyncpa [#allocation4], 0 }
   0x3   :  { %14 = vsyncpa [#allocation4 + $0x1], 0  ;;  %s1366_s18 = smov 0   ;;  %s1368_s19 = smov 0  }
   0x4   :  { %s1370_s20 = smov 0   ;;  %s1372_s21 = smov 0  }
   0x5 LB: > { %s1387_s22 = sadd.s32 4294967295, %s1327_s21   ;;  %s946_s23 = sadd.s32 4294967294, %s1327_s21   ;;  %s1327_s21 = sphi %s1372_s21, %s1562_s21   ;;  %s1323_s20 = sphi %s1370_s20, %s1561_s20   ;;  %s1319_s19 = sphi %s1368_s19, %s1560_s19   ;;  %s1315_s18 = sphi %s1366_s18, %s1559_s18  }
   0x6   : > { %s1391_s24 = sadd.s32 1, %s1327_s21   ;;  %s137_s25 = sadd.s32 1, %s1323_s20 }
   0x7   : > { %s134_s26 = ssub.s32 %s1327_s21, %s1391_s24  ;;  %p147_p0 = scmp.ne.s32.totalorder %s1323_s20, %s1319_s19 }
   0x8   : > { %p135_p1 = scmp.eq.s32.totalorder %s134_s26, 0  ;;  %p148_p2 = scmp.eq.s32.totalorder %s1387_s22, 1 }
   0x9   : > { %p153_p3 = scmp.ne.s32.totalorder %s1319_s19, %s1315_s18  ;;  %p154_p4 = scmp.eq.s32.totalorder %s946_s23, 1 }
   0xa   : > { %s1402_s27 = scalar_select %p135_p1, %s1323_s20, %s137_s25  }
   0xb   : > { %p1404_p5 = por %p148_p2, %p147_p0  ;;  %p1408_p6 = por %p154_p4, %p153_p3 }
   0xc   : > { %p947_p7 = scmp.ge.s32.totalorder %s1327_s21, 1  ;;  %p161_p8 = scmp.lt.s32.totalorder %s1327_s21, 3 }
   0xd   : > { %s1551_s29 = scalar_select %p1408_p6, 1, 0 }
   0xe   : > { %p1549_p9 = scmp.eq.s32.totalorder %s1387_s22, 0  ;;  %p1415_p10 = pnand %p947_p7, %p161_p8 }
   0xf   : > { %s1329_s6 = smov [#allocation2]   ;;  %s1330_s9 = smov [#allocation5]  }
  0x10   : > { %s176_s7 = sshll.u32 %s1329_s6, 4  ;;  %p1039_p11 = pneg %p1415_p10  ;;  %s177_s7 = int_to_ptr.vmem [resolvable:$true] %s176_s7 }
  0x11   : > { %s189_s10 = sshll.u32 %s1330_s9, 4  ;;  %s1218_s11 = scalar_lea.vmem %s177_s7, 4096  ;;  %s190_s10 = int_to_ptr.vmem [resolvable:$true] %s189_s10 }
  0x12   : > { %p1423_p12 = pnand %p1549_p9, %p1039_p11  ;;  %p1219_p0 = scmp.ne.s32.totalorder %s177_s7, %s1218_s11 }
  0x13   : > { %p1226_p3 = scmp.lt.s32.totalorder %s177_s7, %s177_s7  ;;  %p1227_p4 = scmp.lt.s32.totalorder %s1218_s11, %s1218_s11 }
  0x14   : > { %p1209_p13 = pneg %p1423_p12 }
  0x15   : > { %p1228_p7 = por %p1227_p4, %p1226_p3 }
  0x16   : > { %p1221_p1 = pnand %p1219_p0, %p1209_p13 }
  0x18   : > { %p1222_p2 = pneg %p1221_p1 }
  0x1a   : > { %p1229_p8 = pnand %p1228_p7, %p1222_p2 }
  0x1c   : > { %1232 = shalt.err (!%p1229_p8)
}
  0x1d   : > { %s1331_s12 = smov 128   ;;  %s1332_s13 = smov 8  }
  0x1e   : > { %1042 = dma.hbm_to_vmem [thread:$0]  (!%p1423_p12), %s1545_s2, 4096, %s177_s7, [#allocation3], %s1331_s12, %s1331_s12, %s1332_s13  }
  0x1f   : > { %s1244_s16 = scalar_lea.vmem %s190_s10, 4096  ;;  %p1252_p9 = scmp.lt.s32.totalorder %s190_s10, %s190_s10 }
  0x20   : > { %p1245_p11 = scmp.ne.s32.totalorder %s190_s10, %s1244_s16  ;;  %p1253_p6 = scmp.lt.s32.totalorder %s1244_s16, %s1244_s16 }
  0x22   : > { %p1247_p0 = pnand %p1245_p11, %p1209_p13  ;;  %p1254_p3 = por %p1253_p6, %p1252_p9 }
  0x24   : > { %p1248_p1 = pneg %p1247_p0 }
  0x26   : > { %p1255_p2 = pnand %p1254_p3, %p1248_p1 }
  0x28   : > { %1258 = shalt.err (!%p1255_p2)
}
  0x29   : > { %1045 = dma.hbm_to_vmem [thread:$0]  (!%p1423_p12), %s1546_s3, 4096, %s190_s10, [#allocation6], %s1331_s12, %s1331_s12, %s1332_s13  }
  0x2a   : > { %215 = sbr.rel (%p1415_p10) target bundleno = 687 (0x2af), region = 40  ;;  %p1554_p4 = scmp.eq.s32.totalorder (!%p1415_p10), %s1387_s22, 0 }
  0x2f   : > { %1302 = dma.done.wait (%p1554_p4), [#allocation3], 4096   ;;  %p1555_p13 = pmov %p1554_p4 }
  0x30   : > { %p1556_p7 = pmov %p1554_p4 }
  0x31   : > { %1304 = vsyncadd (%p1555_p13), [#allocation3], 4294963200 }
  0x32   : > { %1306 = dma.done.wait (%p1556_p7), [#allocation6], 4096   ;;  %p1557_p6 = pmov %p1554_p4 }
  0x33   : > { %p246_p9 = scmp.lt.s32.totalorder %s1387_s22, 1  ;;  %v1333_v0 = vmov 0   ;;  %v1095_v2 = vld [vmem:[#allocation2 + $0x74] ss:$8 sps:$4 sm:$0xff]   ;;  %v1097_v3 = vld [vmem:[#allocation2 + $0x70] ss:$8 sps:$4 sm:$0xff]   ;;  %v263_v43 = vlaneseq }
  0x34   : > { %1308 = vsyncadd (%p1557_p6), [#allocation6], 4294963200  ;;  %1093 = vset.pattern.permute.xlu0 %v1333_v0  ;;  %v1098_v4 = vld [vmem:[#allocation2 + $0x64] ss:$8 sps:$4 sm:$0xff]   ;;  %536 = vmatprep.subr.bf16.mxu0 %v1095_v2  ;;  %v1100_v5 = vld [vmem:[#allocation2 + $0x60] ss:$8 sps:$4 sm:$0xff]  }
  0x35   : > { %s247_s25 = scalar_select %p246_p9, %s1387_s22, 1  ;;  %537 = vmatpush1.bf16.msra.mxu0 %v1097_v3  ;;  %v1334_v6 = vmov 1   ;;  %v1101_v7 = vld [vmem:[#allocation2 + $0x54] ss:$8 sps:$4 sm:$0xff]   ;;  %v1103_v8 = vld [vmem:[#allocation2 + $0x50] ss:$8 sps:$4 sm:$0xff]  }
  0x36   : > { %538 = vmatprep.subr.bf16.mxu0 %v1098_v4  ;;  %v1104_v9 = vld [vmem:[#allocation2 + $0x44] ss:$8 sps:$4 sm:$0xff]   ;;  %v1106_v10 = vld [vmem:[#allocation2 + $0x40] ss:$8 sps:$4 sm:$0xff]   ;;  %v1107_v11 = vld [vmem:[#allocation2 + $0x34] ss:$8 sps:$4 sm:$0xff]  }
  0x37   : > { %s955_s26 = sshll.u32 %s247_s25, 3  ;;  %v1109_v12 = vld [vmem:[#allocation2 + $0x30] ss:$8 sps:$4 sm:$0xff]   ;;  %v1110_v13 = vld [vmem:[#allocation2 + $0x24] ss:$8 sps:$4 sm:$0xff]   ;;  %v264_v44 = vshrl.u32 %v263_v43, 7 }
  0x38   : > { %s249_s7 = scalar_lea.vmem %s1543_s0, %s955_s26  ;;  %v1112_v14 = vld [vmem:[#allocation2 + $0x20] ss:$8 sps:$4 sm:$0xff]   ;;  %v1113_v15 = vld [vmem:[#allocation2 + $0x14] ss:$8 sps:$4 sm:$0xff]   ;;  %v1115_v16 = vld [vmem:[#allocation2 + $0x10] ss:$8 sps:$4 sm:$0xff]  }
  0x39   : > { %v255_v1 = vld [vmem:[%s249_s7] sm:$0xff]  ;;  %539 = vmatpush1.bf16.msra.mxu0 %v1100_v5  ;;  %v1119_v19 = vld [vmem:[#allocation2 + $0xf4] ss:$8 sps:$4 sm:$0xff]   ;;  %v1121_v20 = vld [vmem:[#allocation2 + $0xf0] ss:$8 sps:$4 sm:$0xff]   ;;  %v1460_v45 = vsub.s32 0, %v264_v44 }
  0x3a   : > { %259 = vperm.xlu0 %1093, %v255_v1   ;;  %540 = vmatprep.subr.bf16.mxu0 %v1101_v7  ;;  %v1116_v17 = vld [vmem:[#allocation2 + $0x4] ss:$8 sps:$4 sm:$0xff]   ;;  %v1118_v18 = vld [vmem:[#allocation2] ss:$8 sps:$4 sm:$0xff]   ;;  %v1125_v23 = vld [vmem:[#allocation2 + $0xd4] ss:$8 sps:$4 sm:$0xff]  }
  0x3b   : > { %v1122_v21 = vld [vmem:[#allocation2 + $0xe4] ss:$8 sps:$4 sm:$0xff]   ;;  %v1124_v22 = vld [vmem:[#allocation2 + $0xe0] ss:$8 sps:$4 sm:$0xff]   ;;  %v1127_v24 = vld [vmem:[#allocation2 + $0xd0] ss:$8 sps:$4 sm:$0xff]  }
  0x3c   : > { %v1128_v25 = vld [vmem:[#allocation2 + $0xc4] ss:$8 sps:$4 sm:$0xff]   ;;  %v1130_v26 = vld [vmem:[#allocation2 + $0xc0] ss:$8 sps:$4 sm:$0xff]   ;;  %v1131_v27 = vld [vmem:[#allocation2 + $0xb4] ss:$8 sps:$4 sm:$0xff]  }
  0x3d   : > { %541 = vmatpush1.bf16.msra.mxu0 %v1103_v8  ;;  %v1133_v28 = vld [vmem:[#allocation2 + $0xb0] ss:$8 sps:$4 sm:$0xff]   ;;  %v1134_v29 = vld [vmem:[#allocation2 + $0xa4] ss:$8 sps:$4 sm:$0xff]   ;;  %v1143_v30 = vld [vmem:[#allocation5 + $0x74] ss:$8 sps:$4 sm:$0xff]  }
  0x3e   : > { %1094 = vset.pattern.permute.xlu0 %v1334_v6  ;;  %542 = vmatprep.subr.bf16.mxu0 %v1104_v9  ;;  %v1145_v31 = vld [vmem:[#allocation5 + $0x70] ss:$8 sps:$4 sm:$0xff]   ;;  %v1146_v32 = vld [vmem:[#allocation5 + $0x64] ss:$8 sps:$4 sm:$0xff]   ;;  %v1136_v33 = vld [vmem:[#allocation2 + $0xa0] ss:$8 sps:$4 sm:$0xff]  }
  0x3f   : > { %291 = vperm.xlu0 %1094, %v255_v1   ;;  %804 = vmatprep.subr.bf16.mxu1 %v1143_v30  ;;  %v1137_v34 = vld [vmem:[#allocation2 + $0x94] ss:$8 sps:$4 sm:$0xff]   ;;  %v1148_v35 = vld [vmem:[#allocation5 + $0x60] ss:$8 sps:$4 sm:$0xff]   ;;  %v1139_v37 = vld [vmem:[#allocation2 + $0x90] ss:$8 sps:$4 sm:$0xff]  }
  0x40   : > { %805 = vmatpush1.bf16.msra.mxu1 %v1145_v31  ;;  %v1149_v36 = vld [vmem:[#allocation5 + $0x54] ss:$8 sps:$4 sm:$0xff]   ;;  %v1140_v38 = vld [vmem:[#allocation2 + $0x84] ss:$8 sps:$4 sm:$0xff]   ;;  %v1151_v39 = vld [vmem:[#allocation5 + $0x50] ss:$8 sps:$4 sm:$0xff]  }
  0x41   : > { %543 = vmatpush1.bf16.msra.mxu0 %v1106_v10  ;;  %806 = vmatprep.subr.bf16.mxu1 %v1146_v32  ;;  %v1152_v40 = vld [vmem:[#allocation5 + $0x44] ss:$8 sps:$4 sm:$0xff]   ;;  %v1142_v41 = vld [vmem:[#allocation2 + $0x80] ss:$8 sps:$4 sm:$0xff]   ;;  %v1462_v46 = vsub.s32 1, %v264_v44  ;;  %s243_s16 = sand.u32 1, %s1319_s19  }
  0x42   : > { %544 = vmatprep.subr.bf16.mxu0 %v1107_v11  ;;  %v1154_v42 = vld [vmem:[#allocation5 + $0x40] ss:$8 sps:$4 sm:$0xff]   ;;  %v1164_v30 = vld [vmem:[#allocation5 + $0x4] ss:$8 sps:$4 sm:$0xff]   ;;  %v1167_v32 = vld [vmem:[#allocation5 + $0xf4] ss:$8 sps:$4 sm:$0xff]  }
  0x43   : > { %v256_v47 = vld [vmem:[%s1544_s1] ss:$2 sm:$0x3]  ;;  %v958_v51 = vld [vmem:[%s1544_s1 + $0x1] ss:$2 sm:$0x3] }
  0x44   : > { %807 = vmatpush1.bf16.msra.mxu1 %v1148_v35  ;;  %v266_v48 = vrot.slane %v256_v47, %v1460_v45  ;;  %v270_v49 = vrot.slane %v256_v47, %v1462_v46  ;;  %v250_v50 = vld [vmem:[%s1547_s4] ss:$4 sm:$0x3]  ;;  %v298_v57 = vrot.slane %v958_v51, %v1460_v45  ;;  %v302_v58 = vrot.slane %v958_v51, %v1462_v46  ;;  %v1185_v44 = vld [vmem:[#allocation5 + $0x94] ss:$8 sps:$4 sm:$0xff]   ;;  %s954_s17 = sshll.u32 %s243_s16, 4 }
  0x45   : > { %545 = vmatpush1.bf16.msra.mxu0 %v1109_v12  ;;  %808 = vmatprep.subr.bf16.mxu1 %v1149_v36  ;;  %v279_v53 = vrot.slane %v250_v50, %v1460_v45  ;;  %v283_v54 = vrot.slane %v250_v50, %v1462_v46  ;;  %v1166_v31 = vld [vmem:[#allocation5] ss:$8 sps:$4 sm:$0xff]   ;;  %v1173_v36 = vld [vmem:[#allocation5 + $0xd4] ss:$8 sps:$4 sm:$0xff]   ;;  %v1187_v47 = vld [vmem:[#allocation5 + $0x90] ss:$8 sps:$4 sm:$0xff]  }
  0x46   : > { %546 = vmatprep.subr.bf16.mxu0 %v1110_v13  ;;  %v1172_v35 = vld [vmem:[#allocation5 + $0xe0] ss:$8 sps:$4 sm:$0xff]   ;;  %s1028_s26 = sshll.u32 %s1387_s22, 8  ;;  %s245_s30 = scalar_lea.vmem [#allocation7], %s954_s17 }
  0x47   : > { %v1184_v43 = vld [vmem:[#allocation5 + $0xa0] ss:$8 sps:$4 sm:$0xff]   ;;  %s865_s6 = sshll.u32 %s245_s30, 4  ;;  %s1502_s9 = scalar_lea.hbm %s1548_s5, %s1028_s26  ;;  %s1504_s6 = int_to_ptr.vmem [resolvable:$true] %s865_s6 }
  0x48   : > { %809 = vmatpush1.bf16.msra.mxu1 %v1151_v39  ;;  %v1178_v39 = vld [vmem:[#allocation5 + $0xc0] ss:$8 sps:$4 sm:$0xff]   ;;  %s851_s22 = scalar_lea.sflag [#allocation4], %s243_s16  ;;  %s1259_s10 = scalar_lea.vmem %s1504_s6, 256 }
  0x49   : > { %547 = vmatpush1.bf16.msra.mxu0 %v1112_v14  ;;  %810 = vmatprep.subr.bf16.mxu1 %v1152_v40  ;;  %v1179_v40 = vld [vmem:[#allocation5 + $0xb4] ss:$8 sps:$4 sm:$0xff]   ;;  %v956_v50 = vld [vmem:[%s1547_s4 + $0x1] ss:$4 sm:$0x3]  ;;  %p1260_p10 = scmp.ne.s32.totalorder %s1504_s6, %s1259_s10  ;;  %s1335_s11 = smov [#allocation7]  }
  0x4a   : > { %548 = vmatprep.subr.bf16.mxu0 %v1113_v15  ;;  %v369_v51 = vrot.slane %v956_v50, %v1460_v45  ;;  %s1263_s12 = sshll.u32 %s1335_s11, 4  ;;  %s1264_s12 = int_to_ptr.vmem [resolvable:$false] %s1263_s12 }
  0x4b   : > { %p1261_p12 = pnand %p1260_p10, %p1404_p5  ;;  %s1265_s13 = scalar_lea.vmem %s1264_s12, 512 }
  0x4c   : > { %811 = vmatpush1.bf16.msra.mxu1 %v1154_v42  ;;  %v1182_v42 = vld [vmem:[#allocation5 + $0xa4] ss:$8 sps:$4 sm:$0xff]   ;;  %p1266_p11 = scmp.lt.s32.totalorder %s1504_s6, %s1264_s12  ;;  %p1267_p0 = scmp.lt.s32.totalorder %s1265_s13, %s1259_s10 }
  0x4d   : > { %549 = vmatpush1.bf16.msra.mxu0 %v1115_v16  ;;  %p1262_p8 = pneg %p1261_p12 }
  0x4e   : > { %550 = vmatprep.subr.bf16.mxu0 %v1116_v17  ;;  %p1268_p1 = por %p1267_p0, %p1266_p11 }
  0x50   : > { %p1269_p3 = pnand %p1268_p1, %p1262_p8 }
  0x51   : > { %551 = vmatpush1.bf16.msra.mxu0 %v1118_v18 }
  0x52   : > { %552 = vmatprep.subr.bf16.mxu0 %v1119_v19 }
  0x55   : > { %553 = vmatpush2.bf16.msra.mxu0 %v1121_v20 }
  0x56   : > { %554 = vmatprep.subr.bf16.mxu0 %v1122_v21 }
  0x59   : > { %555 = vmatpush2.bf16.msra.mxu0 %v1124_v22 }
  0x5a   : > { %556 = vmatprep.subr.bf16.mxu0 %v1125_v23 }
  0x5d   : > { %557 = vmatpush2.bf16.msra.mxu0 %v1127_v24  ;;  %v1155_v24 = vld [vmem:[#allocation5 + $0x34] ss:$8 sps:$4 sm:$0xff]  }
  0x5e   : > { %558 = vmatprep.subr.bf16.mxu0 %v1128_v25  ;;  %v1157_v25 = vld [vmem:[#allocation5 + $0x30] ss:$8 sps:$4 sm:$0xff]   ;;  %812 = vmatprep.subr.bf16.mxu1 %v1155_v24 }
  0x5f   : > { %813 = vmatpush1.bf16.msra.mxu1 %v1157_v25 }
  0x61   : > { %559 = vmatpush2.bf16.msra.mxu0 %v1130_v26  ;;  %v1158_v26 = vld [vmem:[#allocation5 + $0x24] ss:$8 sps:$4 sm:$0xff]  }
  0x62   : > { %560 = vmatprep.subr.bf16.mxu0 %v1131_v27  ;;  %v1160_v27 = vld [vmem:[#allocation5 + $0x20] ss:$8 sps:$4 sm:$0xff]   ;;  %814 = vmatprep.subr.bf16.mxu1 %v1158_v26 }
  0x63   : > { %815 = vmatpush1.bf16.msra.mxu1 %v1160_v27 }
  0x65   : > { %561 = vmatpush2.bf16.msra.mxu0 %v1133_v28  ;;  %v1161_v28 = vld [vmem:[#allocation5 + $0x14] ss:$8 sps:$4 sm:$0xff]  }
  0x66   : > { %562 = vmatprep.subr.bf16.mxu0 %v1134_v29  ;;  %v1163_v29 = vld [vmem:[#allocation5 + $0x10] ss:$8 sps:$4 sm:$0xff]   ;;  %816 = vmatprep.subr.bf16.mxu1 %v1161_v28 }
  0x67   : > { %817 = vmatpush1.bf16.msra.mxu1 %v1163_v29 }
  0x68   : > { %818 = vmatprep.subr.bf16.mxu1 %v1164_v30 }
  0x69   : > { %563 = vmatpush2.bf16.msra.mxu0 %v1136_v33  ;;  %v1169_v33 = vld [vmem:[#allocation5 + $0xf0] ss:$8 sps:$4 sm:$0xff]  }
  0x6a   : > { %564 = vmatprep.subr.bf16.mxu0 %v1137_v34  ;;  %v1170_v34 = vld [vmem:[#allocation5 + $0xe4] ss:$8 sps:$4 sm:$0xff]  }
  0x6b   : > { %819 = vmatpush1.bf16.msra.mxu1 %v1166_v31 }
  0x6c   : > { %820 = vmatprep.subr.bf16.mxu1 %v1167_v32 }
  0x6d   : > { %565 = vmatpush2.bf16.msra.mxu0 %v1139_v37  ;;  %v1175_v37 = vld [vmem:[#allocation5 + $0xd0] ss:$8 sps:$4 sm:$0xff]  }
  0x6e   : > { %566 = vmatprep.subr.bf16.mxu0 %v1140_v38  ;;  %v1176_v38 = vld [vmem:[#allocation5 + $0xc4] ss:$8 sps:$4 sm:$0xff]  }
  0x6f   : > { %821 = vmatpush2.bf16.msra.mxu1 %v1169_v33 }
  0x70   : > { %822 = vmatprep.subr.bf16.mxu1 %v1170_v34 }
  0x71   : > { %567 = vmatpush2.bf16.msra.mxu0 %v1142_v41  ;;  %v1181_v41 = vld [vmem:[#allocation5 + $0xb0] ss:$8 sps:$4 sm:$0xff]  }
  0x73   : > { %823 = vmatpush2.bf16.msra.mxu1 %v1172_v35 }
  0x74   : > { %824 = vmatprep.subr.bf16.mxu1 %v1173_v36 }
  0x77   : > { %825 = vmatpush2.bf16.msra.mxu1 %v1175_v37 }
  0x78   : > { %826 = vmatprep.subr.bf16.mxu1 %v1176_v38 }
  0x7b   : > { %827 = vmatpush2.bf16.msra.mxu1 %v1178_v39 }
  0x7c   : > { %828 = vmatprep.subr.bf16.mxu1 %v1179_v40 }
  0x7f   : > { %829 = vmatpush2.bf16.msra.mxu1 %v1181_v41 }
  0x80   : > { %830 = vmatprep.subr.bf16.mxu1 %v1182_v42 }
  0x83   : > { %831 = vmatpush2.bf16.msra.mxu1 %v1184_v43 }
  0x84   : > { %832 = vmatprep.subr.bf16.mxu1 %v1185_v44 }
  0x87   : > { %833 = vmatpush2.bf16.msra.mxu1 %v1187_v47 }
  0xb5   : > { %v260_v52 = vpop.permute.xlu0 %259 }
  0xb6   : > { %v273_v55 = vmul.f32 %v266_v48, %v260_v52  ;;  %v274_v56 = vmul.f32 %v270_v49, %v260_v52  ;;  %v1188_v48 = vld [vmem:[#allocation5 + $0x84] ss:$8 sps:$4 sm:$0xff]   ;;  %v1190_v49 = vld [vmem:[#allocation5 + $0x80] ss:$8 sps:$4 sm:$0xff]   ;;  %v373_v52 = vrot.slane %v956_v50, %v1462_v46 }
  0xb7   : > { %834 = vmatprep.subr.bf16.mxu1 %v1188_v48 }
  0xb8   : > { %v286_v60 = vadd.f32 %v279_v53, %v273_v55  ;;  %v287_v61 = vadd.f32 %v283_v54, %v274_v56  ;;  %835 = vmatpush2.bf16.msra.mxu1 %v1190_v49 }
  0xba   : > { %v292_v59 = vpop.permute.xlu0 %291 }
  0xbb   : > { %v305_v62 = vmul.f32 %v298_v57, %v292_v59  ;;  %v306_v63 = vmul.f32 %v302_v58, %v292_v59 }
  0xbd   : > { %v307_v0 = vadd.f32 %v305_v62, %v286_v60  ;;  %v308_v1 = vadd.f32 %v306_v63, %v287_v61 }
  0xbf   : > { %vm310_vm0 = vcmp.gt.f32.partialorder %v308_v1, 20.0  ;;  %vm309_vm1 = vcmp.gt.f32.partialorder %v307_v0, 20.0 }
  0xc0   : > { %v312_v2 = vsel %vm310_vm0, 0.0, %v308_v1  ;;  %v311_v3 = vsel %vm309_vm1, 0.0, %v307_v0 }
  0xc1   : > { %v315_v4 = vmul.f32 1.442695, %v312_v2  ;;  %v313_v5 = vmul.f32 1.442695, %v311_v3 }
  0xc3   : > { %1191 = vpow2.f32 %v315_v4 }
  0xc4   : > { %1193 = vpow2.f32 %v313_v5 }
  0xd0   : > { %v1192_v6 = vpop.eup %1191 }
  0xd1   : > { %v1194_v7 = vpop.eup %1193  ;;  %v318_v8 = vadd.f32 2.0, %v1192_v6 }
  0xd2   : > { %v317_v9 = vadd.f32 2.0, %v1194_v7 }
  0xd3   : > { %v320_v10 = vmul.f32 %v1192_v6, %v318_v8 }
  0xd4   : > { %v319_v11 = vmul.f32 %v1194_v7, %v317_v9 }
  0xd5   : > { %v324_v12 = vadd.f32 2.0, %v320_v10  ;;  %v322_v14 = vmul.f32 %v320_v10, %v308_v1 }
  0xd6   : > { %v323_v13 = vadd.f32 2.0, %v319_v11  ;;  %v321_v16 = vmul.f32 %v319_v11, %v307_v0 }
  0xd7   : > { %1195 = vrcp.f32 %v324_v12 }
  0xd8   : > { %1197 = vrcp.f32 %v323_v13 }
  0xe4   : > { %v1196_v15 = vpop.eup %1195 }
  0xe5   : > { %v1198_v17 = vpop.eup %1197  ;;  %v328_v18 = vmul.f32 %v1196_v15, %v322_v14 }
  0xe6   : > { %v327_v19 = vmul.f32 %v1198_v17, %v321_v16  ;;  %v957_v17 = vld [vmem:[%s1547_s4 + $0x2] ss:$4 sm:$0x3] }
  0xe7   : > { %v330_v20 = vsel %vm310_vm0, %v308_v1, %v328_v18  ;;  %v637_v18 = vrot.slane %v957_v17, %v1460_v45 }
  0xe8   : > { %v332_v21 = vpack.c.bf16 %v330_v20, %v330_v20  ;;  %v329_v22 = vsel %vm309_vm1, %v307_v0, %v327_v19  ;;  %v641_v19 = vrot.slane %v957_v17, %v1462_v46 }
  0xe9   : > { %v331_v23 = vpack.c.bf16 %v329_v22, %v329_v22 }
  0xea   : > { %568 = vmatprep.mubr.bf16.mxu0 %v332_v21 }
  0xeb   : > { %569 = vmatmul.mubr.bf16.vlgmr.msra.gmra.mxu0 %v331_v23 }
 0x1ab   : > { %v570_v53 = vpop.f32.mrf.mxu0 }
 0x1ac   : > { %v571_v54 = vadd.f32 %v570_v53, %v369_v51 }
 0x1ad   : > { %v572_v55 = vpop.f32.mrf.mxu0 }
 0x1ae   : > { %v573_v56 = vadd.f32 %v572_v55, %v373_v52  ;;  %vm577_vm2 = vcmp.gt.f32.partialorder %v571_v54, 20.0 }
 0x1af   : > { %v574_v57 = vpop.f32.mrf.mxu0  ;;  %v579_v58 = vsel %vm577_vm2, 0.0, %v571_v54 }
 0x1b0   : > { %vm578_vm3 = vcmp.gt.f32.partialorder %v573_v56, 20.0  ;;  %v581_v59 = vmul.f32 1.442695, %v579_v58 }
 0x1b1   : > { %v575_v60 = vpop.f32.mrf.mxu0  ;;  %v580_v61 = vsel %vm578_vm3, 0.0, %v573_v56 }
 0x1b2   : > { %v583_v62 = vmul.f32 1.442695, %v580_v61  ;;  %1199 = vpow2.f32 %v581_v59 }
 0x1b4   : > { %1201 = vpow2.f32 %v583_v62 }
 0x1bf   : > { %v1200_v63 = vpop.eup %1199 }
 0x1c0   : > { %v585_v0 = vadd.f32 2.0, %v1200_v63 }
 0x1c1   : > { %v1202_v1 = vpop.eup %1201 }
 0x1c2   : > { %v586_v2 = vadd.f32 2.0, %v1202_v1  ;;  %v587_v3 = vmul.f32 %v1200_v63, %v585_v0 }
 0x1c4   : > { %v588_v4 = vmul.f32 %v1202_v1, %v586_v2  ;;  %v591_v5 = vadd.f32 2.0, %v587_v3  ;;  %v589_v7 = vmul.f32 %v587_v3, %v571_v54 }
 0x1c6   : > { %v592_v6 = vadd.f32 2.0, %v588_v4  ;;  %1203 = vrcp.f32 %v591_v5  ;;  %v590_v9 = vmul.f32 %v588_v4, %v573_v56 }
 0x1c8   : > { %1205 = vrcp.f32 %v592_v6 }
 0x1d3   : > { %v1204_v8 = vpop.eup %1203 }
 0x1d4   : > { %v595_v10 = vmul.f32 %v1204_v8, %v589_v7 }
 0x1d5   : > { %v1206_v11 = vpop.eup %1205 }
 0x1d6   : > { %v596_v12 = vmul.f32 %v1206_v11, %v590_v9  ;;  %v597_v13 = vsel %vm577_vm2, %v571_v54, %v595_v10 }
 0x1d7   : > { %v599_v16 = vpack.c.bf16 %v597_v13, %v597_v13 }
 0x1d8   : > { %v598_v14 = vsel %vm578_vm3, %v573_v56, %v596_v12 }
 0x1d9   : > { %v600_v15 = vpack.c.bf16 %v598_v14, %v598_v14 }
 0x1db   : > { %836 = vmatprep.mubr.bf16.mxu1 %v600_v15 }
 0x1dc   : > { %837 = vmatmul.mubr.bf16.vlgmr.msra.gmra.mxu1 %v599_v16 }
 0x29c   : > { %v838_v20 = vpop.f32.mrf.mxu1 }
 0x29d   : > { %v839_v21 = vadd.f32 %v838_v20, %v637_v18 }
 0x29e   : > { %v840_v22 = vpop.f32.mrf.mxu1 }
 0x29f   : > { %848 = vst [vmem:[%s245_s30] sm:$0xff] %v839_v21  ;;  %v841_v23 = vadd.f32 %v840_v22, %v641_v19 }
 0x2a0   : > { %v842_v45 = vpop.f32.mrf.mxu1 }
 0x2a1   : > { %849 = vst [vmem:[%s245_s30 + $0x8] sm:$0xff] %v841_v23 }
 0x2a2   : > { %v843_v46 = vpop.f32.mrf.mxu1 }
 0x2a3   : > { %1272 = shalt.err (!%p1269_p3)
}
 0x2a4   : > { %s1273_s14 = scalar_lea.hbm %s1502_s9, 256  ;;  %s1277_s17 = scalar_lea.hbm %s1548_s5, 512 }
 0x2a5   : > { %p1274_p2 = scmp.ne.s32.totalorder %s1502_s9, %s1273_s14  ;;  %p1278_p7 = scmp.lt.s32.totalorder %s1502_s9, %s1548_s5 }
 0x2a6   : > { %p1279_p6 = scmp.lt.s32.totalorder %s1277_s17, %s1273_s14 }
 0x2a7   : > { %p1275_p4 = pnand %p1274_p2, %p1404_p5 }
 0x2a8   : > { %p1280_p9 = por %p1279_p6, %p1278_p7 }
 0x2a9   : > { %p1276_p13 = pneg %p1275_p4 }
 0x2ab   : > { %p1281_p10 = pnand %p1280_p9, %p1276_p13 }
 0x2ad   : > { %1284 = shalt.err (!%p1281_p10)
}
 0x2ae   : > { %1037 = dma.vmem_to_hbm [thread:$0]  (%p1404_p5), %s1504_s6, 256, %s1502_s9, %s851_s22  }
 0x2af PF: > { %p1054_p12 = scmp.ge.s32.totalorder %s1327_s21, 2  ;;  %s877_s26 = sand.u32 1, %s1315_s18  }
 0x2b0   : > { %p1558_p8 = scmp.ne.s32.totalorder %s1551_s29, 0  ;;  %s878_s30 = scalar_lea.sflag [#allocation4], %s877_s26 }
 0x2b2   : > { %p1047_p11 = pnand %p1054_p12, %p1558_p8 }
 0x2b4   : > { %p1048_p0 = pneg %p1047_p11 }
 0x2b6   : > { %1310 = dma.done.wait (%p1048_p0), %s878_s30, 256  }
 0x2b7   : > { %1312 = vsyncadd (%p1048_p0), %s878_s30, 4294967040  ;;  %p17_p1 = scmp.ge.s32.totalorder %s1391_s24, 4   ;;  %s1559_s18 = smov %s1319_s19 }
 0x2b8   : > { %s1560_s19 = smov %s1323_s20  ;;  %s1561_s20 = smov %s1402_s27 }
 0x2b9   : > { %s1562_s21 = smov %s1391_s24  ;;  %19 = sbr.rel (!%p17_p1) target bundleno = 5 (0x5), region = 88 }
 0x2be   :  { %883 = vsyncpa [#allocation3], 1 }
 0x2bf   :  { %885 = vsyncpa [#allocation3 + $0x1], 1 }
 0x2c0   :  { %886 = vsyncpa [#allocation6], 1 }
 0x2c1   :  { %887 = vsyncpa [#allocation4], 1 }
 0x2c2   :  { %889 = vsyncpa [#allocation4 + $0x1], 1 }

</bundles_post_ra>
